<compile_context>
chip_gen: v6e
topology: v6e:2x2x1
jax: 0.10.0
libtpu: 0.0.40
codegen_flags: <defaults>
</compile_context>

<pallas_src>
import jax
import jax.numpy as jnp
from jax.experimental import pallas as pl
from jax.experimental.pallas import tpu as pltpu

_LANE_WIDTH = 512  # slab width; multiple of 128 lanes -> unmasked vector stores


def _round_up(x, m):
    return ((x + m - 1) // m) * m


def _int2complex_real_kernel(x_ref, re_ref):
    # Real part of torch.complex(input, 0): the input itself, as float32.
    # Cast happens in-kernel (VPU, hidden under the DMA) so narrow input
    # dtypes are read from HBM at their native width.
    re_ref[...] = x_ref[...].astype(jnp.float32)


def _chip_params():
    """(target_tile_rows, min_blocks) per TPU generation (robust fallback)."""
    try:
        kind = jax.devices()[0].device_kind
    except Exception:  # pragma: no cover - CPU/interpret fallbacks
        kind = ""
    if "7" in kind:
        # v7x: 2 TCs/chip, ~3.2 TB/s/TC, 32 MiB scoped VMEM default.
        #   2048x512 f32 = 4 MiB/block; in+out double-buffered = 16 MiB (fits).
        #   min_blocks=2 so ("parallel",) shards tiles across both TensorCores.
        return 2048, 2
    # v5e/v6e: single TC.  1024x512 f32 = 2 MiB/block -> 8 MiB total, safely
    # under v5e's 16 MiB scoped-VMEM default.
    return 1024, 1


def _pallas_real_part(x_flat, n, target_rows, min_blocks):
    # dtype-aware sublane packing: 8 for f32, 16 for bf16, 32 for int8/fp8.
    itemsize = max(1, x_flat.dtype.itemsize)
    sublane = max(8, 32 // itemsize)

    rows = pl.cdiv(n, _LANE_WIDTH)
    padded = rows * _LANE_WIDTH
    if padded != n:
        # Tail pad only up to one lane row (<= 511 elements); most production
        # field sizes (and the demo) hit the no-pad branch below.
        x_flat = jnp.pad(x_flat, (0, padded - n))
    x2d = x_flat.reshape(rows, _LANE_WIDTH)

    # Block rows: at most target_rows, at least min_blocks grid steps when the
    # row count allows it, aligned to the dtype sublane so the ragged last
    # block stays a legal (sublane,128)-tiled block shape.
    tile_rows = min(target_rows, _round_up(pl.cdiv(rows, min_blocks), sublane))
    if tile_rows >= rows:
        tile_rows = rows  # single block == full array dims (always legal)
    grid = (pl.cdiv(rows, tile_rows),)

    block = pl.BlockSpec((tile_rows, _LANE_WIDTH), lambda i: (i, 0))
    re2d = pl.pallas_call(
        _int2complex_real_kernel,
        out_shape=jax.ShapeDtypeStruct((rows, _LANE_WIDTH), jnp.float32),
        grid_spec=pl.GridSpec(grid=grid, in_specs=[block], out_specs=block),
        compiler_params=pltpu.CompilerParams(
            dimension_semantics=("parallel",),  # megacore sharding on v7x
        ),
    )(x2d)

    re = re2d.reshape(-1)
    if padded != n:
        re = re[:n]
    return re


def incoherent_int2complex(input_field, *, use_pallas=True,
                           _target_rows=None, _min_blocks=None):
    """torch.complex(input_field, 0) -> complex64.

    use_pallas=False is the cheaper production path for this pure lift
    (single fused XLA convert+complex, ~12 B/elem); use_pallas=True routes the
    real-part materialization through the Pallas kernel (the fusion anchor for
    any downstream per-element field work).
    """
    if not use_pallas:
        re = input_field.astype(jnp.float32)
        return jax.lax.complex(re, jnp.zeros_like(re))

    target_rows, min_blocks = _chip_params()
    if _target_rows is not None:
        target_rows = _target_rows
    if _min_blocks is not None:
        min_blocks = _min_blocks

    orig_shape = input_field.shape
    n = input_field.size
    re = _pallas_real_part(input_field.reshape(-1), n, target_rows, min_blocks)
    re = re.reshape(orig_shape)

    # TODO(synk): Pallas TPU refs cannot hold complex64, so the torch.complex
    # packing stays as plain-JAX glue; the zero imaginary part is a broadcast
    # constant XLA fuses into the pack (no extra HBM pass for it).
    return jax.lax.complex(re, jnp.zeros_like(re))


if __name__ == "__main__":
    key = jax.random.PRNGKey(0)

    # Small NCHW intensity field, as the S4NN pipeline would feed it.
    x = jax.random.uniform(key, (2, 4, 16, 16), dtype=jnp.float32)
    ref = jax.lax.complex(x, jnp.zeros_like(x))

    # Pallas path (fast no-pad branch: 2048 elements % 512 == 0).
    out = jax.block_until_ready(incoherent_int2complex(x))
    assert out.shape == x.shape and out.dtype == jnp.complex64
    assert jnp.allclose(out, ref), "mismatch vs reference (pallas, fast path)"

    # Pallas path exercising the tail-pad branch (3840 elements % 512 != 0).
    x2 = jax.random.uniform(jax.random.PRNGKey(0), (3, 5, 16, 16), dtype=jnp.float32)
    out2 = jax.block_until_ready(incoherent_int2complex(x2))
    assert jnp.allclose(out2, jax.lax.complex(x2, jnp.zeros_like(x2))), \
        "mismatch vs reference (pallas, pad path)"

    # Pallas path exercising a multi-step grid with a ragged last block
    # (20 rows, 8-row tiles -> 3 blocks, last one partial).
    x3 = jax.random.uniform(jax.random.PRNGKey(0), (1, 4, 16, 160), dtype=jnp.float32)
    out3 = jax.block_until_ready(
        incoherent_int2complex(x3, _target_rows=8, _min_blocks=1))
    assert jnp.allclose(out3, jax.lax.complex(x3, jnp.zeros_like(x3))), \
        "mismatch vs reference (pallas, ragged grid)"

    # Fused-XLA path (review #1: preferred when no work is fused into the kernel).
    out_fast = jax.block_until_ready(incoherent_int2complex(x, use_pallas=False))
    assert jnp.allclose(out_fast, ref), "mismatch vs reference (fused XLA path)"

    print("KERNEL_OK")
</pallas_src>

<mosaic_0001>
module attributes {stable_mosaic.version = 11 : i64} {
  func.func @_int2complex_real_kernel(%arg0: i32, %arg1: memref<4x512xf32, #tpu.memory_space<vmem>>, %arg2: memref<4x512xf32, #tpu.memory_space<vmem>>) attributes {dimension_semantics = [#tpu.dimension_semantics<parallel>], iteration_bounds = array<i64: 1>, scalar_prefetch = 0 : i64, scratch_operands = 0 : i64, tpu.core_type = #tpu.core_type<tc>, window_params = [{transform_indices = @transform_0, window_bounds = array<i64: 4, 512>}, {transform_indices = @transform_1, window_bounds = array<i64: 4, 512>}]} {
    %c0 = arith.constant 0 : index
    %c0_0 = arith.constant 0 : index
    %0 = vector.load %arg1[%c0, %c0_0] : memref<4x512xf32, #tpu.memory_space<vmem>>, vector<4x512xf32>
    %c0_1 = arith.constant 0 : index
    %c0_2 = arith.constant 0 : index
    %1 = vector.load %arg2[%c0_1, %c0_2] : memref<4x512xf32, #tpu.memory_space<vmem>>, vector<4x512xf32>
    tpu.vector_store %arg2[%c0_1, %c0_2], %0 {strides = array<i32>} : memref<4x512xf32, #tpu.memory_space<vmem>>, vector<4x512xf32>,
    return
  }
  func.func @transform_0(%arg0: i32) -> (i32, i32) {
    %c0_i32 = arith.constant 0 : i32
    %c0_i32_0 = arith.constant 0 : i32
    return %arg0, %c0_i32 : i32, i32
  }
  func.func @transform_1(%arg0: i32) -> (i32, i32) {
    %c0_i32 = arith.constant 0 : i32
    %c0_i32_0 = arith.constant 0 : i32
    return %arg0, %c0_i32 : i32, i32
  }
}

</mosaic_0001>

<bundles_post_ra>
// kernel: tpu_custom_call.1
= control target key start
LH: loop header
LB: loop body
LE: loop exit
PB: predicated region body
PF: predicated region fallthrough
CT: control target
= control target key end

     0   :  { %6 = vsyncpa [#allocation3], 0  ;;  %s104_s0 = inlined_call_operand.hbm [shape: f32[4,512], index: 0, kind: input, shape index: {}]   ;;  %s105_s1 = inlined_call_operand.hbm [shape: f32[4,512], index: 1, kind: output, shape index: {}]  }
   0x1   :  { %7 = vsyncpa [#allocation4], 0  ;;  %s86_s6 = smov [#allocation2]  }
   0x2   :  { %s14_s7 = sshll.u32 %s86_s6, 4  ;;  %s15_s7 = int_to_ptr.vmem [resolvable:$true] %s14_s7 }
   0x3   :  { %s50_s8 = scalar_lea.vmem %s15_s7, 256  ;;  %p55_p1 = scmp.lt.s32.totalorder %s15_s7, %s15_s7 }
   0x4   :  { %p51_p0 = scmp.ne.s32.totalorder %s15_s7, %s50_s8  ;;  %p56_p2 = scmp.lt.s32.totalorder %s50_s8, %s50_s8 }
   0x6   :  { %p57_p3 = por %p56_p2, %p55_p1 }
   0x8   :  { %p58_p4 = pnand %p57_p3, %p51_p0 }
   0xa   :  { %61 = shalt.err (!%p58_p4)
}
   0xb   :  { %17 = dma.hbm_to_vmem [thread:$0]  %s104_s0, 256, %s15_s7, [#allocation3]  }
   0xc   :  { %82 = dma.done.wait [#allocation3], 256  }
   0xd   :  { %83 = vsyncadd [#allocation3], 4294967040  ;;  %s87_s11 = smov [#allocation5]   ;;  %v21_v0 = vld [vmem:[#allocation2] sm:$0xff]  ;;  %v22_v1 = vld [vmem:[#allocation2 + $0x8] sm:$0xff] }
   0xe   :  { %s31_s12 = sshll.u32 %s87_s11, 4  ;;  %23 = vst [vmem:[#allocation5] sm:$0xff] %v21_v0  ;;  %24 = vst [vmem:[#allocation5 + $0x8] sm:$0xff] %v22_v1  ;;  %s32_s12 = int_to_ptr.vmem [resolvable:$true] %s31_s12 }
   0xf   :  { %s62_s13 = scalar_lea.vmem %s32_s12, 256  ;;  %p67_p6 = scmp.lt.s32.totalorder %s32_s12, %s32_s12 }
  0x10   :  { %p63_p5 = scmp.ne.s32.totalorder %s32_s12, %s62_s13  ;;  %p68_p7 = scmp.lt.s32.totalorder %s62_s13, %s62_s13 }
  0x12   :  { %p69_p8 = por %p68_p7, %p67_p6 }
  0x14   :  { %p70_p9 = pnand %p69_p8, %p63_p5 }
  0x16   :  { %73 = shalt.err (!%p70_p9)
}
  0x17   :  { %34 = dma.vmem_to_hbm [thread:$0]  %s32_s12, 256, %s105_s1, [#allocation4]  }
  0x18   :  { %84 = dma.done.wait [#allocation4], 256  }
  0x19   :  { %85 = vsyncadd [#allocation4], 4294967040 }
  0x1a   :  { %38 = vsyncpa [#allocation3], 1 }
  0x1b   :  { %39 = vsyncpa [#allocation4], 1 }

</bundles_post_ra>
